<compile_context>
chip_gen: v7x
topology: tpu7x:2x2x1
jax: 0.10.0
libtpu: 0.0.40
codegen_flags: <defaults>
</compile_context>

<pallas_src>
import functools

import jax
import jax.numpy as jnp
import numpy as np
from jax import lax
from jax.experimental import pallas as pl
from jax.experimental.pallas import tpu as pltpu

# TODO(synk): Makser.gnn (class GNN) is not defined in the provided source;
# only the MLPLayer head (node_rep -> mask probability) is implemented here.


def _round_up(a: int, b: int) -> int:
    return ((a + b - 1) // b) * b


def mlp_kernel(x_ref, w1_ref, b1_ref, w2_ref, b2_ref, w3t_ref, b3t_ref, o_ref,
               *, compute_dtype):
    x = x_ref[...]                                            # (tile, in_dim)

    # Layer 1: MXU matmul with f32 accumulation; bias + ReLU in f32 on VPU.
    h1 = jnp.dot(x, w1_ref[...], preferred_element_type=jnp.float32)
    h1 = jnp.maximum(h1 + b1_ref[...], 0.0)                   # (tile, hid) f32

    # Layer 2.
    h2 = jnp.dot(h1.astype(compute_dtype), w2_ref[...],
                 preferred_element_type=jnp.float32)
    h2 = jnp.maximum(h2 + b2_ref[...], 0.0)                   # (tile, in_dim) f32

    # Layer 3: contract (out_dim, in_dim) with (tile, in_dim) over in_dim,
    # producing the lane-dense (out_dim, tile) logit row directly.
    logits = lax.dot_general(
        w3t_ref[...], h2.astype(compute_dtype),
        dimension_numbers=(((1,), (1,)), ((), ())),
        preferred_element_type=jnp.float32)
    logits = logits + b3t_ref[...]                            # + (out_dim, 1)

    # Sigmoid in f32 (exp goes to the EUP; exact divide keeps tight accuracy).
    o_ref[...] = (1.0 / (1.0 + jnp.exp(-logits))).astype(o_ref.dtype)


def mlp_layer_forward(x, params, *, tile_n=512, compute_dtype=jnp.bfloat16):
    """Pallas MLPLayer.forward.  Returns a 1-D array of length N * out_dim."""
    w1, b1, w2, b2, w3, b3 = params
    N, in_dim = x.shape
    hid = w1.shape[1]
    out_dim = w3.shape[1]
    cd = np.dtype(compute_dtype)

    # Row tile: multiple of 128 (lane-dense output store, sublane-aligned x),
    # capped near N; pad N up to a tile multiple so any batch size works.
    tile = min(_round_up(max(tile_n, 1), 128), _round_up(N, 128))
    n_pad = _round_up(N, tile)
    grid = (n_pad // tile,)

    # Cast MXU operands to compute_dtype; biases / epilogue stay f32.
    xc = x.astype(cd)
    if n_pad != N:
        xc = jnp.pad(xc, ((0, n_pad - N), (0, 0)))
    w1c, w2c = w1.astype(cd), w2.astype(cd)
    w3t = w3.T.astype(cd)                                     # (out_dim, in_dim)
    b1f, b2f = b1.astype(jnp.float32), b2.astype(jnp.float32)
    b3t = b3.astype(jnp.float32).reshape(out_dim, 1)          # (out_dim, 1)

    # VMEM budget: double-buffered x/out tiles + weights + f32/bf16 temps,
    # with 2x headroom, capped at v7x's 64 MiB physical VMEM.
    est = (2 * tile * in_dim * cd.itemsize
           + 2 * (in_dim * hid + hid * in_dim + out_dim * in_dim) * cd.itemsize
           + 2 * (hid + in_dim + out_dim) * 4
           + 2 * out_dim * tile * 4
           + tile * (hid + in_dim) * (4 + cd.itemsize)
           + tile * max(hid, in_dim) * 4)
    vmem_limit = min(max(2 * est, 32 * 1024 * 1024), 64 * 1024 * 1024)

    cost = pl.CostEstimate(
        flops=2 * N * (in_dim * hid + hid * in_dim + in_dim * out_dim),
        transcendentals=N * out_dim,
        bytes_accessed=(N * in_dim * cd.itemsize
                        + (in_dim * hid + hid * in_dim + in_dim * out_dim) * cd.itemsize
                        + (hid + in_dim + out_dim) * 4
                        + N * out_dim * 4),
    )

    kernel = functools.partial(mlp_kernel, compute_dtype=cd)

    out = pl.pallas_call(
        kernel,
        out_shape=jax.ShapeDtypeStruct((out_dim, n_pad), jnp.float32),
        grid_spec=pltpu.PrefetchScalarGridSpec(
            num_scalar_prefetch=0,
            grid=grid,
            in_specs=[
                pl.BlockSpec((tile, in_dim), lambda i: (i, 0)),     # x rows
                pl.BlockSpec((in_dim, hid), lambda i: (0, 0)),      # W1
                pl.BlockSpec((1, hid), lambda i: (0, 0)),           # b1
                pl.BlockSpec((hid, in_dim), lambda i: (0, 0)),      # W2
                pl.BlockSpec((1, in_dim), lambda i: (0, 0)),        # b2
                pl.BlockSpec((out_dim, in_dim), lambda i: (0, 0)),  # W3^T
                pl.BlockSpec((out_dim, 1), lambda i: (0, 0)),       # b3^T
            ],
            out_specs=pl.BlockSpec((out_dim, tile), lambda i: (0, i)),
        ),
        compiler_params=pltpu.CompilerParams(
            dimension_semantics=("parallel",),
            vmem_limit_bytes=vmem_limit,
        ),
        cost_estimate=cost,
    )(xc, w1c, b1f, w2c, b2f, w3t, b3t)

    # (out_dim, n_pad) -> drop padded rows -> row-major flatten (= torch .view(-1)).
    return out[:, :N].T.reshape(-1)


def init_mlp_params(key, in_dim, out_dim=1):
    """xavier_uniform_ weights (stored as (in, out)), torch-default uniform biases."""
    dims = [(in_dim, in_dim * 2), (in_dim * 2, in_dim), (in_dim, out_dim)]
    params = []
    for fan_in, fan_out in dims:
        key, kw, kb = jax.random.split(key, 3)
        bound_w = np.sqrt(6.0 / (fan_in + fan_out))
        w = jax.random.uniform(kw, (fan_in, fan_out), jnp.float32,
                               minval=-bound_w, maxval=bound_w)
        bound_b = 1.0 / np.sqrt(fan_in)
        b = jax.random.uniform(kb, (1, fan_out), jnp.float32,
                               minval=-bound_b, maxval=bound_b)
        params.extend([w, b])
    return tuple(params)


def mlp_reference(x, params, compute_dtype=jnp.bfloat16):
    """Matched-precision reference (same bf16 MXU inputs, f32 accumulation)."""
    w1, b1, w2, b2, w3, b3 = params
    cd = np.dtype(compute_dtype)
    h = jnp.dot(x.astype(cd), w1.astype(cd),
                preferred_element_type=jnp.float32) + b1
    h = jnp.maximum(h, 0.0)
    h = jnp.dot(h.astype(cd), w2.astype(cd),
                preferred_element_type=jnp.float32) + b2
    h = jnp.maximum(h, 0.0)
    logits = jnp.dot(h.astype(cd), w3.astype(cd),
                     preferred_element_type=jnp.float32) + b3
    return (1.0 / (1.0 + jnp.exp(-logits))).reshape(-1)


def mlp_reference_f32(x, params):
    w1, b1, w2, b2, w3, b3 = params
    h = jnp.maximum(x @ w1 + b1, 0.0)
    h = jnp.maximum(h @ w2 + b2, 0.0)
    return (1.0 / (1.0 + jnp.exp(-(h @ w3 + b3)))).reshape(-1)


if __name__ == "__main__":
    key = jax.random.PRNGKey(0)
    in_dim, out_dim = 32, 1

    key, kx = jax.random.split(key)
    params = init_mlp_params(key, in_dim, out_dim)

    # --- Small batch (pads to a single 128-row tile) ---
    x_small = jax.random.normal(kx, (8, in_dim), jnp.float32)

    # Exact f32 path check (tight tolerance).
    y32 = jax.block_until_ready(
        mlp_layer_forward(x_small, params, compute_dtype=jnp.float32))
    np.testing.assert_allclose(np.asarray(y32),
                               np.asarray(mlp_reference_f32(x_small, params)),
                               rtol=1e-5, atol=1e-5)

    # Default bf16-MXU path vs matched-precision reference + f32 sanity check.
    y = jax.block_until_ready(mlp_layer_forward(x_small, params))
    np.testing.assert_allclose(np.asarray(y),
                               np.asarray(mlp_reference(x_small, params)),
                               rtol=1e-4, atol=1e-4)
    np.testing.assert_allclose(np.asarray(y),
                               np.asarray(mlp_reference_f32(x_small, params)),
                               rtol=0.0, atol=5e-2)
    assert y.shape == (8 * out_dim,)

    # --- Ragged multi-tile batch (N=300 -> 3 x 128-row tiles + padding) ---
    key, kx2 = jax.random.split(key)
    x_big = jax.random.normal(kx2, (300, in_dim), jnp.float32)
    y2 = jax.block_until_ready(mlp_layer_forward(x_big, params, tile_n=128))
    np.testing.assert_allclose(np.asarray(y2),
                               np.asarray(mlp_reference(x_big, params)),
                               rtol=1e-4, atol=1e-4)
    assert y2.shape == (300 * out_dim,)

    print("KERNEL_OK")
</pallas_src>

<mosaic_0001>
module attributes {stable_mosaic.version = 11 : i64} {
  func.func @mlp_kernel(%arg0: i32, %arg1: memref<128x32xf32, #tpu.memory_space<vmem>>, %arg2: memref<32x64xf32, #tpu.memory_space<vmem>>, %arg3: memref<1x64xf32, #tpu.memory_space<vmem>>, %arg4: memref<64x32xf32, #tpu.memory_space<vmem>>, %arg5: memref<1x32xf32, #tpu.memory_space<vmem>>, %arg6: memref<1x32xf32, #tpu.memory_space<vmem>>, %arg7: memref<1x1xf32, #tpu.memory_space<vmem>>, %arg8: memref<1x128xf32, #tpu.memory_space<vmem>>) attributes {dimension_semantics = [#tpu.dimension_semantics<parallel>], iteration_bounds = array<i64: 1>, scalar_prefetch = 0 : i64, scratch_operands = 0 : i64, tpu.core_type = #tpu.core_type<tc>, window_params = [{transform_indices = @transform_0, window_bounds = array<i64: 128, 32>}, {pipeline_mode = #tpu.pipeline_mode<synchronous>, transform_indices = @transform_1, window_bounds = array<i64: 32, 64>}, {pipeline_mode = #tpu.pipeline_mode<synchronous>, transform_indices = @transform_2, window_bounds = array<i64: 1, 64>}, {pipeline_mode = #tpu.pipeline_mode<synchronous>, transform_indices = @transform_3, window_bounds = array<i64: 64, 32>}, {pipeline_mode = #tpu.pipeline_mode<synchronous>, transform_indices = @transform_4, window_bounds = array<i64: 1, 32>}, {pipeline_mode = #tpu.pipeline_mode<synchronous>, transform_indices = @transform_5, window_bounds = array<i64: 1, 32>}, {pipeline_mode = #tpu.pipeline_mode<synchronous>, transform_indices = @transform_6, window_bounds = array<i64: 1, 1>}, {transform_indices = @transform_7, window_bounds = array<i64: 1, 128>}]} {
    %c0 = arith.constant 0 : index
    %c0_0 = arith.constant 0 : index
    %0 = vector.load %arg1[%c0, %c0_0] : memref<128x32xf32, #tpu.memory_space<vmem>>, vector<128x32xf32>
    %c0_1 = arith.constant 0 : index
    %c0_2 = arith.constant 0 : index
    %1 = vector.load %arg2[%c0_1, %c0_2] : memref<32x64xf32, #tpu.memory_space<vmem>>, vector<32x64xf32>
    %cst = arith.constant dense<0.000000e+00> : vector<128x64xf32>
    %2 = tpu.matmul %0, %1, %cst {dimension_numbers = #tpu.dot_dimension_numbers<[1], [0], [0], [1], [0, 0, 1, 1], [], []>} : vector<128x32xf32>, vector<32x64xf32>, vector<128x64xf32> -> vector<128x64xf32>
    %c0_3 = arith.constant 0 : index
    %c0_4 = arith.constant 0 : index
    %3 = vector.load %arg3[%c0_3, %c0_4] : memref<1x64xf32, #tpu.memory_space<vmem>>, vector<1x64xf32>
    %4 = vector.broadcast %3 : vector<1x64xf32> to vector<128x64xf32>
    %5 = arith.addf %2, %4 : vector<128x64xf32>
    %cst_5 = arith.constant 0.000000e+00 : f32
    %6 = vector.broadcast %cst_5 : f32 to vector<128x64xf32>
    %7 = arith.maximumf %5, %6 : vector<128x64xf32>
    %c0_6 = arith.constant 0 : index
    %c0_7 = arith.constant 0 : index
    %8 = vector.load %arg4[%c0_6, %c0_7] : memref<64x32xf32, #tpu.memory_space<vmem>>, vector<64x32xf32>
    %cst_8 = arith.constant dense<0.000000e+00> : vector<128x32xf32>
    %9 = tpu.matmul %7, %8, %cst_8 {dimension_numbers = #tpu.dot_dimension_numbers<[1], [0], [0], [1], [0, 0, 1, 1], [], []>} : vector<128x64xf32>, vector<64x32xf32>, vector<128x32xf32> -> vector<128x32xf32>
    %c0_9 = arith.constant 0 : index
    %c0_10 = arith.constant 0 : index
    %10 = vector.load %arg5[%c0_9, %c0_10] : memref<1x32xf32, #tpu.memory_space<vmem>>, vector<1x32xf32>
    %11 = vector.broadcast %10 : vector<1x32xf32> to vector<128x32xf32>
    %12 = arith.addf %9, %11 : vector<128x32xf32>
    %cst_11 = arith.constant 0.000000e+00 : f32
    %13 = vector.broadcast %cst_11 : f32 to vector<128x32xf32>
    %14 = arith.maximumf %12, %13 : vector<128x32xf32>
    %c0_12 = arith.constant 0 : index
    %c0_13 = arith.constant 0 : index
    %15 = vector.load %arg6[%c0_12, %c0_13] : memref<1x32xf32, #tpu.memory_space<vmem>>, vector<1x32xf32>
    %cst_14 = arith.constant dense<0.000000e+00> : vector<1x128xf32>
    %16 = tpu.matmul %15, %14, %cst_14 {dimension_numbers = #tpu.dot_dimension_numbers<[1], [1], [0], [0], [0, 0, 1, 0], [], []>} : vector<1x32xf32>, vector<128x32xf32>, vector<1x128xf32> -> vector<1x128xf32>
    %c0_15 = arith.constant 0 : index
    %c0_16 = arith.constant 0 : index
    %17 = vector.load %arg7[%c0_15, %c0_16] : memref<1x1xf32, #tpu.memory_space<vmem>>, vector<1x1xf32>
    %18 = vector.broadcast %17 : vector<1x1xf32> to vector<1x128xf32>
    %19 = arith.addf %16, %18 : vector<1x128xf32>
    %cst_17 = arith.constant 0.000000e+00 : f32
    %20 = vector.broadcast %cst_17 : f32 to vector<1x128xf32>
    %21 = arith.subf %20, %19 : vector<1x128xf32>
    %22 = math.exp %21 : vector<1x128xf32>
    %cst_18 = arith.constant 1.000000e+00 : f32
    %23 = vector.broadcast %cst_18 : f32 to vector<1x128xf32>
    %24 = arith.addf %23, %22 : vector<1x128xf32>
    %cst_19 = arith.constant 1.000000e+00 : f32
    %25 = vector.broadcast %cst_19 : f32 to vector<1x128xf32>
    %26 = arith.divf %25, %24 : vector<1x128xf32>
    %c0_20 = arith.constant 0 : index
    %c0_21 = arith.constant 0 : index
    %27 = vector.load %arg8[%c0_20, %c0_21] : memref<1x128xf32, #tpu.memory_space<vmem>>, vector<1x128xf32>
    tpu.vector_store %arg8[%c0_20, %c0_21], %26 {strides = array<i32>} : memref<1x128xf32, #tpu.memory_space<vmem>>, vector<1x128xf32>,
    return
  }
  func.func @transform_0(%arg0: i32) -> (i32, i32) {
    %c0_i32 = arith.constant 0 : i32
    %c0_i32_0 = arith.constant 0 : i32
    return %arg0, %c0_i32 : i32, i32
  }
  func.func @transform_1(%arg0: i32) -> (i32, i32) {
    %c0_i32 = arith.constant 0 : i32
    %c0_i32_0 = arith.constant 0 : i32
    %c0_i32_1 = arith.constant 0 : i32
    return %c0_i32, %c0_i32_0 : i32, i32
  }
  func.func @transform_2(%arg0: i32) -> (i32, i32) {
    %c0_i32 = arith.constant 0 : i32
    %c0_i32_0 = arith.constant 0 : i32
    %c0_i32_1 = arith.constant 0 : i32
    return %c0_i32, %c0_i32_0 : i32, i32
  }
  func.func @transform_3(%arg0: i32) -> (i32, i32) {
    %c0_i32 = arith.constant 0 : i32
    %c0_i32_0 = arith.constant 0 : i32
    %c0_i32_1 = arith.constant 0 : i32
    return %c0_i32, %c0_i32_0 : i32, i32
  }
  func.func @transform_4(%arg0: i32) -> (i32, i32) {
    %c0_i32 = arith.constant 0 : i32
    %c0_i32_0 = arith.constant 0 : i32
    %c0_i32_1 = arith.constant 0 : i32
    return %c0_i32, %c0_i32_0 : i32, i32
  }
  func.func @transform_5(%arg0: i32) -> (i32, i32) {
    %c0_i32 = arith.constant 0 : i32
    %c0_i32_0 = arith.constant 0 : i32
    %c0_i32_1 = arith.constant 0 : i32
    return %c0_i32, %c0_i32_0 : i32, i32
  }
  func.func @transform_6(%arg0: i32) -> (i32, i32) {
    %c0_i32 = arith.constant 0 : i32
    %c0_i32_0 = arith.constant 0 : i32
    %c0_i32_1 = arith.constant 0 : i32
    return %c0_i32, %c0_i32_0 : i32, i32
  }
  func.func @transform_7(%arg0: i32) -> (i32, i32) {
    %c0_i32 = arith.constant 0 : i32
    %c0_i32_0 = arith.constant 0 : i32
    return %c0_i32, %arg0 : i32, i32
  }
}

</mosaic_0001>

<bundles_post_ra>
// kernel: tpu_custom_call.1
= control target key start
LH: loop header
LB: loop body
LE: loop exit
PB: predicated region body
PF: predicated region fallthrough
CT: control target
= control target key end

     0   :  { %s1169_s0 = inlined_call_operand.vmem [shape: f32[128,32], index: 0, kind: input, shape index: {}]   ;;  %s1170_s1 = inlined_call_operand.vmem [shape: f32[32,64], index: 1, kind: input, shape index: {}]   ;;  %s1171_s2 = inlined_call_operand.vmem [shape: f32[1,64], index: 2, kind: input, shape index: {}]   ;;  %s1172_s3 = inlined_call_operand.vmem [shape: f32[64,32], index: 3, kind: input, shape index: {}]   ;;  %s1173_s4 = inlined_call_operand.vmem [shape: f32[1,32], index: 4, kind: input, shape index: {}]   ;;  %s1174_s5 = inlined_call_operand.vmem [shape: f32[1,32], index: 5, kind: input, shape index: {}]   ;;  %s1175_s6 = inlined_call_operand.<no memory space> [shape: f32[1,1], index: 6, kind: input, shape index: {}]   ;;  %s1176_s7 = inlined_call_operand.hbm [shape: f32[1,128], index: 7, kind: output, shape index: {}]  }
   0x1   :  { %v12_v0 = vstv %s1175_s6 }
   0x2   :  { %13 = vst [vmem:[#allocation2] sm:$0x1] %v12_v0 }
   0x3   :  { %v45_v1 = vld [vmem:[%s1170_s1] sm:$0xff]  ;;  %v46_v2 = vld [vmem:[%s1170_s1 + $0x8] sm:$0xff]  ;;  %v47_v3 = vld [vmem:[%s1170_s1 + $0x10] sm:$0xff]  ;;  %vm56_vm0 = vcmask 261120  }
   0x4   :  { %v863_v4 = vpack.c.bf16 %v46_v2, %v45_v1  ;;  %v48_v5 = vld [vmem:[%s1170_s1 + $0x18] sm:$0xff]  ;;  %v29_v6 = vld [vmem:[%s1169_s0] sm:$0xff]  ;;  %v267_v9 = vld [vmem:[%s1172_s3 + $0x8] sm:$0xff] }
   0x5   :  { %v867_v7 = vpack.c.bf16 %v48_v5, %v47_v3  ;;  %764 = vmatprep.mubr.msk.f32.mxu1 %vm56_vm0, %v29_v6  ;;  %v266_v8 = vld [vmem:[%s1172_s3] sm:$0xff]  ;;  %v268_v10 = vld [vmem:[%s1172_s3 + $0x10] sm:$0xff]  ;;  %v269_v11 = vld [vmem:[%s1172_s3 + $0x18] sm:$0xff] }
   0x6   :  { %864 = vmatprep.subr.bf16.mxu1 %v863_v4  ;;  %v30_v12 = vld [vmem:[%s1169_s0 + $0x8] sm:$0xff]  ;;  %v871_v13 = vpack.c.bf16 %v267_v9, %v266_v8  ;;  %v31_v14 = vld [vmem:[%s1169_s0 + $0x10] sm:$0xff]  ;;  %v875_v15 = vpack.c.bf16 %v269_v11, %v268_v10 }
   0x7   :  { %866 = vmatpush3.bf16.msra.mxu1 %v863_v4 }
   0x8   :  { %868 = vmatprep.subr.bf16.mxu1 %v867_v7 }
   0xb   :  { %870 = vmatpush3.bf16.msra.mxu1 %v867_v7 }
   0xc   :  { %14 = vsyncpa [#allocation4], 0  ;;  %872 = vmatprep.subr.bf16.mxu1 %v871_v13  ;;  %v270_v16 = vld [vmem:[%s1172_s3 + $0x20] sm:$0xff]  ;;  %v271_v17 = vld [vmem:[%s1172_s3 + $0x28] sm:$0xff]  ;;  %vm281_vm1 = vcmask 523264   ;;  %vm954_vm2 = vmmov 0  }
   0xd   :  { %v32_v18 = vld [vmem:[%s1169_s0 + $0x18] sm:$0xff]  ;;  %v33_v19 = vld [vmem:[%s1169_s0 + $0x20] sm:$0xff]  ;;  %v879_v20 = vpack.c.bf16 %v271_v17, %v270_v16  ;;  %v272_v21 = vld [vmem:[%s1172_s3 + $0x30] sm:$0xff]  ;;  %s957_s6 = smov [#allocation3]  }
   0xe   :  { %765 = vmatmul.mubr.msk.f32.vlgmr.msra.gmra.mrb[0].mxu1 %vm56_vm0, %v30_v12  ;;  %v273_v22 = vld [vmem:[%s1172_s3 + $0x38] sm:$0xff]  ;;  %v34_v23 = vld [vmem:[%s1169_s0 + $0x28] sm:$0xff]  ;;  %v35_v24 = vld [vmem:[%s1169_s0 + $0x30] sm:$0xff]  ;;  %s636_s11 = sshll.u32 %s957_s6, 4  ;;  %s637_s11 = int_to_ptr.vmem [resolvable:$true] %s636_s11 }
   0xf   :  { %767 = vmatprep.mubr.msk.f32.mxu1 %vm56_vm0, %v31_v14  ;;  %874 = vmatpush3.bf16.msra.mxu1 %v871_v13  ;;  %v883_v25 = vpack.c.bf16 %v273_v22, %v272_v21  ;;  %v36_v26 = vld [vmem:[%s1169_s0 + $0x38] sm:$0xff]  ;;  %v37_v27 = vld [vmem:[%s1169_s0 + $0x40] sm:$0xff]  ;;  %v38_v28 = vld [vmem:[%s1169_s0 + $0x48] sm:$0xff]  ;;  %v955_v21 = vmov 0.0   ;;  %s933_s12 = scalar_lea.vmem %s637_s11, 32  ;;  %p934_p1 = scmp.lt.s32.totalorder %s637_s11, %s637_s11 }
  0x10   :  { %876 = vmatprep.subr.bf16.mxu1 %v875_v15  ;;  %v39_v29 = vld [vmem:[%s1169_s0 + $0x50] sm:$0xff]  ;;  %v40_v30 = vld [vmem:[%s1169_s0 + $0x58] sm:$0xff]  ;;  %v41_v31 = vld [vmem:[%s1169_s0 + $0x60] sm:$0xff]  ;;  %860 = vmatprep.mubr.msk.f32.mxu0 %vm954_vm2, %v955_v21 }
  0x11   :  { %v42_v32 = vld [vmem:[%s1169_s0 + $0x68] sm:$0xff]  ;;  %v43_v33 = vld [vmem:[%s1169_s0 + $0x70] sm:$0xff]  ;;  %v44_v34 = vld [vmem:[%s1169_s0 + $0x78] sm:$0xff] }
  0x12   :  { %768 = vmatmul.mubr.msk.f32.gmra.mrb[2].mxu1 %vm56_vm0, %v32_v18  ;;  %v644_v35 = vld [vmem:[%s1171_s2] ss:$0 sm:$0xff]  ;;  %vm1126_vm3 = vmpackc.low %vm56_vm0, %vm56_vm0 }
  0x13   :  { %770 = vmatprep.mubr.msk.f32.mxu1 %vm56_vm0, %v33_v19  ;;  %878 = vmatpush3.bf16.msra.mxu1 %v875_v15  ;;  %v492_v22 = vld [vmem:[#allocation2] sm:$0x1] }
  0x14   :  { %880 = vmatprep.subr.bf16.mxu1 %v879_v20 }
  0x16   :  { %771 = vmatmul.mubr.msk.f32.gmra.mrb[4].mxu1 %vm56_vm0, %v34_v23  ;;  %v956_v23 = vmov 0  }
  0x17   :  { %773 = vmatprep.mubr.msk.f32.mxu1 %vm56_vm0, %v35_v24  ;;  %882 = vmatpush3.bf16.msra.mxu1 %v879_v20  ;;  %v953_v20 = vmov 0.0|0.0   ;;  %v661_v24 = vld [vmem:[%s1173_s4] ss:$0 sm:$0xff] }
  0x18   :  { %884 = vmatprep.subr.bf16.mxu1 %v883_v25  ;;  %887 = vmatprep.subr.bf16.mxu0 %v953_v20 }
  0x19   :  { %924 = vset.pattern.permute.xlu0 %v956_v23 }
  0x1a   :  { %774 = vmatmul.mubr.msk.f32.gmra.mrb[6].mxu1 %vm56_vm0, %v36_v26  ;;  %495 = vperm.xlu0 %924, %v492_v22  }
  0x1b   :  { %776 = vmatprep.mubr.msk.f32.mxu1 %vm56_vm0, %v37_v27  ;;  %886 = vmatpush3.bf16.msra.mxu1 %v883_v25 }
  0x1e   :  { %777 = vmatmul.mubr.msk.f32.gmra.mrb[8].mxu1 %vm56_vm0, %v38_v28 }
  0x1f   :  { %779 = vmatprep.mubr.msk.f32.mxu1 %vm56_vm0, %v39_v29 }
  0x22   :  { %780 = vmatmul.mubr.msk.f32.gmra.mrb[10].mxu1 %vm56_vm0, %v40_v30 }
  0x23   :  { %782 = vmatprep.mubr.msk.f32.mxu1 %vm56_vm0, %v41_v31 }
  0x26   :  { %783 = vmatmul.mubr.msk.f32.gmra.mrb[12].mxu1 %vm56_vm0, %v42_v32 }
  0x27   :  { %785 = vmatprep.mubr.msk.f32.mxu1 %vm56_vm0, %v43_v33 }
  0x2a   :  { %786 = vmatmul.mubr.msk.f32.gmra.mrb[14].mxu1 %vm56_vm0, %v44_v34 }
  0x99   :  { %v496_v23 = vpop.permute.xlu0 %495 }
  0xe1   :  { %v766_v36 = vpop.f32.mrb[0].mxu1 }
  0xe2   :  { %v177_v37 = vadd.f32 %v766_v36, %v644_v35  ;;  %v171_v38 = vpop.f32.mrb[1].mxu1 }
  0xe3   :  { %v172_v39 = vadd.f32 %v644_v35, %v171_v38 }
  0xe4   :  { %v251_v42 = vmax.f32 %v177_v37, 0.0 }
  0xe5   :  { %v250_v40 = vmax.f32 %v172_v39, 0.0  ;;  %v769_v41 = vpop.f32.mrb[2].mxu1 }
  0xe6   :  { %v187_v43 = vadd.f32 %v769_v41, %v644_v35  ;;  %v181_v44 = vpop.f32.mrb[3].mxu1 }
  0xe7   :  { %v182_v45 = vadd.f32 %v644_v35, %v181_v44  ;;  %804 = vmatprep.mubr.msk.f32.mxu1 %vm281_vm1, %v250_v40 }
  0xe8   :  { %v253_v46 = vmax.f32 %v187_v43, 0.0  ;;  %805 = vmatmul.mubr.msk.f32.vlgmr.msra.gmra.mrb[16].mxu1 %vm281_vm1, %v251_v42 }
  0xe9   :  { %v252_v47 = vmax.f32 %v182_v45, 0.0  ;;  %v772_v48 = vpop.f32.mrb[4].mxu1 }
  0xea   :  { %v197_v49 = vadd.f32 %v772_v48, %v644_v35  ;;  %v191_v50 = vpop.f32.mrb[5].mxu1 }
  0xeb   :  { %807 = vmatprep.mubr.msk.f32.mxu1 %vm281_vm1, %v252_v47  ;;  %v192_v51 = vadd.f32 %v644_v35, %v191_v50 }
  0xec   :  { %808 = vmatmul.mubr.msk.f32.gmra.mrb[18].mxu1 %vm281_vm1, %v253_v46  ;;  %v255_v52 = vmax.f32 %v197_v49, 0.0 }
  0xed   :  { %v254_v53 = vmax.f32 %v192_v51, 0.0  ;;  %v775_v54 = vpop.f32.mrb[6].mxu1 }
  0xee   :  { %v207_v55 = vadd.f32 %v775_v54, %v644_v35  ;;  %v201_v56 = vpop.f32.mrb[7].mxu1 }
  0xef   :  { %810 = vmatprep.mubr.msk.f32.mxu1 %vm281_vm1, %v254_v53  ;;  %v202_v57 = vadd.f32 %v644_v35, %v201_v56 }
  0xf0   :  { %811 = vmatmul.mubr.msk.f32.gmra.mrb[20].mxu1 %vm281_vm1, %v255_v52  ;;  %v257_v58 = vmax.f32 %v207_v55, 0.0 }
  0xf1   :  { %v256_v59 = vmax.f32 %v202_v57, 0.0  ;;  %v778_v60 = vpop.f32.mrb[8].mxu1 }
  0xf2   :  { %v217_v61 = vadd.f32 %v778_v60, %v644_v35  ;;  %v211_v62 = vpop.f32.mrb[9].mxu1 }
  0xf3   :  { %813 = vmatprep.mubr.msk.f32.mxu1 %vm281_vm1, %v256_v59  ;;  %v212_v63 = vadd.f32 %v644_v35, %v211_v62 }
  0xf4   :  { %814 = vmatmul.mubr.msk.f32.gmra.mrb[22].mxu1 %vm281_vm1, %v257_v58  ;;  %v259_v0 = vmax.f32 %v217_v61, 0.0 }
  0xf5   :  { %v258_v1 = vmax.f32 %v212_v63, 0.0  ;;  %v781_v2 = vpop.f32.mrb[10].mxu1 }
  0xf6   :  { %v227_v3 = vadd.f32 %v781_v2, %v644_v35  ;;  %v221_v4 = vpop.f32.mrb[11].mxu1 }
  0xf7   :  { %816 = vmatprep.mubr.msk.f32.mxu1 %vm281_vm1, %v258_v1  ;;  %v222_v5 = vadd.f32 %v644_v35, %v221_v4 }
  0xf8   :  { %817 = vmatmul.mubr.msk.f32.gmra.mrb[24].mxu1 %vm281_vm1, %v259_v0  ;;  %v261_v6 = vmax.f32 %v227_v3, 0.0 }
  0xf9   :  { %v260_v7 = vmax.f32 %v222_v5, 0.0  ;;  %v784_v8 = vpop.f32.mrb[12].mxu1 }
  0xfa   :  { %v237_v9 = vadd.f32 %v784_v8, %v644_v35  ;;  %v231_v10 = vpop.f32.mrb[13].mxu1 }
  0xfb   :  { %819 = vmatprep.mubr.msk.f32.mxu1 %vm281_vm1, %v260_v7  ;;  %v232_v11 = vadd.f32 %v644_v35, %v231_v10 }
  0xfc   :  { %820 = vmatmul.mubr.msk.f32.gmra.mrb[26].mxu1 %vm281_vm1, %v261_v6  ;;  %v263_v12 = vmax.f32 %v237_v9, 0.0 }
  0xfd   :  { %v262_v13 = vmax.f32 %v232_v11, 0.0  ;;  %v787_v14 = vpop.f32.mrb[14].mxu1 }
  0xfe   :  { %v247_v15 = vadd.f32 %v787_v14, %v644_v35  ;;  %v241_v16 = vpop.f32.mrb[15].mxu1 }
  0xff   :  { %822 = vmatprep.mubr.msk.f32.mxu1 %vm281_vm1, %v262_v13  ;;  %v242_v17 = vadd.f32 %v644_v35, %v241_v16 }
 0x100   :  { %823 = vmatmul.mubr.msk.f32.gmra.mrb[28].mxu1 %vm281_vm1, %v263_v12  ;;  %v265_v18 = vmax.f32 %v247_v15, 0.0 }
 0x101   :  { %v264_v19 = vmax.f32 %v242_v17, 0.0 }
 0x103   :  { %825 = vmatprep.mubr.msk.f32.mxu1 %vm281_vm1, %v264_v19  ;;  %v498_v19 = vlaneseq }
 0x104   :  { %826 = vmatmul.mubr.msk.f32.gmra.mrb[30].mxu1 %vm281_vm1, %v265_v18  ;;  %v491_v18 = vld [vmem:[%s1174_s5] sm:$0x1]  ;;  %s929_s5 = scalar_lea.vmem %s637_s11, 16 }
 0x105   :  { %v499_v21 = vshrl.u32 %v498_v19, 7  ;;  %p930_p0 = scmp.ne.s32.totalorder %s637_s11, %s929_s5  ;;  %p935_p2 = scmp.lt.s32.totalorder %s933_s12, %s929_s5 }
 0x107   :  { %v500_v22 = vsub.s32 0, %v499_v21  ;;  %p936_p3 = por %p935_p2, %p934_p1 }
 0x109   :  { %p937_p4 = pnand %p936_p3, %p930_p0 }
 0x1bb   :  { %v806_v25 = vpop.f32.mrb[16].mxu1 }
 0x1bc   :  { %v402_v26 = vadd.f32 %v806_v25, %v661_v24  ;;  %v396_v27 = vpop.f32.mrb[17].mxu1 }
 0x1bd   :  { %v397_v28 = vadd.f32 %v661_v24, %v396_v27 }
 0x1be   :  { %v476_v29 = vmax.f32 %v402_v26, 0.0 }
 0x1bf   :  { %v475_v30 = vmax.f32 %v397_v28, 0.0  ;;  %v809_v31 = vpop.f32.mrb[18].mxu1 }
 0x1c0   :  { %v412_v32 = vadd.f32 %v809_v31, %v661_v24  ;;  %v406_v33 = vpop.f32.mrb[19].mxu1 }
 0x1c1   :  { %v888_v35 = vpack.c.bf16 %v476_v29, %v475_v30  ;;  %v407_v36 = vadd.f32 %v661_v24, %v406_v33 }
 0x1c2   :  { %v478_v37 = vmax.f32 %v412_v32, 0.0 }
 0x1c3   :  { %v477_v38 = vmax.f32 %v407_v36, 0.0  ;;  %890 = vmatpush3.bf16.xpose.msk.msra.mxu0 %vm1126_vm3, %v888_v35  ;;  %v812_v39 = vpop.f32.mrb[20].mxu1 }
 0x1c4   :  { %v422_v40 = vadd.f32 %v812_v39, %v661_v24  ;;  %v416_v41 = vpop.f32.mrb[21].mxu1  ;;  %891 = vmatprep.subr.bf16.mxu0 %v953_v20 }
 0x1c5   :  { %v892_v42 = vpack.c.bf16 %v478_v37, %v477_v38  ;;  %v417_v43 = vadd.f32 %v661_v24, %v416_v41 }
 0x1c6   :  { %v480_v44 = vmax.f32 %v422_v40, 0.0 }
 0x1c7   :  { %v479_v45 = vmax.f32 %v417_v43, 0.0  ;;  %v815_v46 = vpop.f32.mrb[22].mxu1 }
 0x1c8   :  { %v432_v47 = vadd.f32 %v815_v46, %v661_v24  ;;  %v426_v48 = vpop.f32.mrb[23].mxu1 }
 0x1c9   :  { %v896_v49 = vpack.c.bf16 %v480_v44, %v479_v45  ;;  %v427_v50 = vadd.f32 %v661_v24, %v426_v48 }
 0x1ca   :  { %v482_v51 = vmax.f32 %v432_v47, 0.0 }
 0x1cb   :  { %894 = vmatpush3.bf16.xpose.msk.msra.mxu0 %vm1126_vm3, %v892_v42  ;;  %v481_v52 = vmax.f32 %v427_v50, 0.0  ;;  %v818_v53 = vpop.f32.mrb[24].mxu1 }
 0x1cc   :  { %895 = vmatprep.subr.bf16.mxu0 %v953_v20  ;;  %v442_v54 = vadd.f32 %v818_v53, %v661_v24  ;;  %v436_v55 = vpop.f32.mrb[25].mxu1 }
 0x1cd   :  { %v900_v56 = vpack.c.bf16 %v482_v51, %v481_v52  ;;  %v437_v57 = vadd.f32 %v661_v24, %v436_v55 }
 0x1ce   :  { %v484_v58 = vmax.f32 %v442_v54, 0.0 }
 0x1cf   :  { %v483_v59 = vmax.f32 %v437_v57, 0.0  ;;  %v821_v60 = vpop.f32.mrb[26].mxu1 }
 0x1d0   :  { %v452_v61 = vadd.f32 %v821_v60, %v661_v24  ;;  %v446_v62 = vpop.f32.mrb[27].mxu1 }
 0x1d1   :  { %v904_v63 = vpack.c.bf16 %v484_v58, %v483_v59  ;;  %v447_v0 = vadd.f32 %v661_v24, %v446_v62 }
 0x1d2   :  { %v486_v1 = vmax.f32 %v452_v61, 0.0 }
 0x1d3   :  { %898 = vmatpush3.bf16.xpose.msk.msra.mxu0 %vm1126_vm3, %v896_v49  ;;  %v485_v2 = vmax.f32 %v447_v0, 0.0  ;;  %v824_v3 = vpop.f32.mrb[28].mxu1 }
 0x1d4   :  { %899 = vmatprep.subr.bf16.mxu0 %v953_v20  ;;  %v462_v4 = vadd.f32 %v824_v3, %v661_v24  ;;  %v456_v5 = vpop.f32.mrb[29].mxu1 }
 0x1d5   :  { %v908_v6 = vpack.c.bf16 %v486_v1, %v485_v2  ;;  %v457_v7 = vadd.f32 %v661_v24, %v456_v5 }
 0x1d6   :  { %v488_v8 = vmax.f32 %v462_v4, 0.0 }
 0x1d7   :  { %v487_v9 = vmax.f32 %v457_v7, 0.0  ;;  %v827_v10 = vpop.f32.mrb[30].mxu1 }
 0x1d8   :  { %v472_v11 = vadd.f32 %v827_v10, %v661_v24  ;;  %v466_v12 = vpop.f32.mrb[31].mxu1 }
 0x1d9   :  { %v912_v13 = vpack.c.bf16 %v488_v8, %v487_v9  ;;  %v467_v14 = vadd.f32 %v661_v24, %v466_v12  ;;  %v501_v24 = vrot.slane %v496_v23, %v500_v22 }
 0x1da   :  { %v490_v15 = vmax.f32 %v472_v11, 0.0 }
 0x1db   :  { %902 = vmatpush3.bf16.xpose.msk.msra.mxu0 %vm1126_vm3, %v900_v56  ;;  %v489_v16 = vmax.f32 %v467_v14, 0.0 }
 0x1dc   :  { %903 = vmatprep.subr.bf16.mxu0 %v953_v20 }
 0x1dd   :  { %v916_v17 = vpack.c.bf16 %v490_v15, %v489_v16 }
 0x1e3   :  { %906 = vmatpush3.bf16.xpose.msk.msra.mxu0 %vm1126_vm3, %v904_v63 }
 0x1e4   :  { %907 = vmatprep.subr.bf16.mxu0 %v953_v20 }
 0x1eb   :  { %910 = vmatpush3.bf16.xpose.msk.msra.mxu0 %vm1126_vm3, %v908_v6 }
 0x1ec   :  { %911 = vmatprep.subr.bf16.mxu0 %v953_v20 }
 0x1f3   :  { %914 = vmatpush3.bf16.xpose.msk.msra.mxu0 %vm1126_vm3, %v912_v13 }
 0x1f4   :  { %915 = vmatprep.subr.bf16.mxu0 %v953_v20 }
 0x1fb   :  { %918 = vmatpush3.bf16.xpose.msk.msra.mxu0 %vm1126_vm3, %v916_v17 }
 0x202   :  { %861 = vmatmul.mubr.msk.f32.vlgmr.msra.gmra.mrb[0].mxu0 %vm56_vm0, %v491_v18 }
 0x2d5   :  { %v619_v25 = vpop.f32.mrb[0].mxu0 }
 0x2d6   :  { %v620_v26 = vadd.f32 %v619_v25, %v501_v24  ;;  %v862_v27 = vpop.f32.mrb[1].mxu0 }
 0x2d8   :  { %v623_v28 = vsub.f32 0.0, %v620_v26 }
 0x2da   :  { %v624_v29 = vmul.f32 1.442695, %v623_v28 }
 0x2dc   :  { %925 = vpow2.f32 %v624_v29 }
 0x2e6   :  { %v926_v20 = vpop.eup %925 }
 0x2e7   :  { %v626_v30 = vadd.f32 1.0, %v926_v20 }
 0x2e9   :  { %927 = vrcp.f32 %v626_v30 }
 0x2f3   :  { %v928_v31 = vpop.eup %927 }
 0x2f4   :  { %629 = vst [vmem:[#allocation3] sm:$0x1] %v928_v31 }
 0x2f5   :  { %940 = shalt.err (!%p937_p4)
}
 0x2f6   :  { %s941_s3 = scalar_lea.hbm %s1176_s7, 16 }
 0x2f7   :  { %p942_p5 = scmp.ne.s32.totalorder %s1176_s7, %s941_s3  ;;  %p945_p6 = scmp.lt.u32.totalorder %s941_s3, %s1176_s7 }
 0x2f9   :  { %p947_p7 = pnand %p945_p6, %p942_p5 }
 0x2fb   :  { %950 = shalt.err (!%p947_p7)
}
 0x2fc   :  { %639 = dma.vmem_to_hbm [thread:$0]  %s637_s11, 16, %s1176_s7, [#allocation4]  }
 0x2fd   :  { %951 = dma.done.wait [#allocation4], 16  }
 0x2fe   :  { %952 = vsyncadd [#allocation4], 4294967280 }
 0x2ff   :  { %643 = vsyncpa [#allocation4], 1 }

</bundles_post_ra>
